<compile_context>
chip_gen: v6e
topology: v6e:2x2x1
jax: 0.10.0
libtpu: 0.0.40
codegen_flags: <defaults>
</compile_context>

<pallas_src>
import jax
import jax.numpy as jnp
from jax.experimental import pallas as pl
from jax.experimental.pallas import tpu as pltpu


# ----------------------------------------------------------------------------
# 1) Primary path: the empty Sequential is a true no-op.
# ----------------------------------------------------------------------------
def ips_forward(x: jax.Array) -> jax.Array:
    """Pallas-equivalent of IPS.forward. The empty nn.Sequential is the
    identity, so the optimal implementation is to return x unchanged."""
    return x


# ----------------------------------------------------------------------------
# 2) Preferred materialized copy (only if a distinct buffer is required):
#    XLA-native, fusible, no custom-call boundary.
# ----------------------------------------------------------------------------
def ips_forward_materialized(x: jax.Array) -> jax.Array:
    """Identity that yields a new buffer via an XLA-native copy (preferred
    over any Pallas custom call for this no-op)."""
    return jnp.copy(x)


# ----------------------------------------------------------------------------
# 3) Opt-in / rare: Pallas HBM->HBM DMA copy, striped over the leading dim
#    so multiple DMA queues stay busy on multi-GiB inputs. No VMEM staging.
# ----------------------------------------------------------------------------
def _make_striped_hbm_copy_kernel(num_stripes: int, rows_per_stripe: int,
                                  leading: int):
    def kernel(x_hbm, o_hbm, sems):
        copies = []
        for s in range(num_stripes):  # static unroll; num_stripes is tiny
            start = s * rows_per_stripe
            size = min(rows_per_stripe, leading - start)
            cp = pltpu.make_async_copy(
                x_hbm.at[pl.ds(start, size)],
                o_hbm.at[pl.ds(start, size)],
                sems.at[s],
            )
            cp.start()
            copies.append(cp)
        for cp in copies:
            cp.wait()
    return kernel


def _whole_array_copy_kernel(x_hbm, o_hbm, sem):
    cp = pltpu.make_async_copy(x_hbm, o_hbm, sem)
    cp.start()
    cp.wait()


def ips_forward_materialized_pallas(x: jax.Array,
                                    max_stripes: int = 4) -> jax.Array:
    """Identity producing a new buffer via direct HBM->HBM DMA. Kept only for
    generality over large arrays; for small tensors prefer
    ips_forward_materialized (XLA copy) or ips_forward (no copy at all)."""
    itemsize = jnp.dtype(x.dtype).itemsize
    cost = pl.CostEstimate(
        flops=0,
        transcendentals=0,
        bytes_accessed=2 * x.size * itemsize,
    )

    leading = x.shape[0] if x.ndim >= 1 else 0
    if x.ndim >= 1 and leading >= 2 * max_stripes:
        # Stripe the copy: N in-flight DMAs over the leading dimension.
        num_stripes = max_stripes
        rows_per_stripe = pl.cdiv(leading, num_stripes)
        kernel = _make_striped_hbm_copy_kernel(num_stripes, rows_per_stripe,
                                               leading)
        sem_shape = pltpu.SemaphoreType.DMA((num_stripes,))
    else:
        # Small / low-rank input: a single descriptor is optimal.
        kernel = _whole_array_copy_kernel
        sem_shape = pltpu.SemaphoreType.DMA(())

    return pl.pallas_call(
        kernel,
        out_shape=jax.ShapeDtypeStruct(x.shape, x.dtype),
        # Leave both operands in place (raw HBM refs, no auto-DMA pipeline,
        # no VMEM footprint -> no v7x 64 MiB concern).
        in_specs=[pl.BlockSpec(memory_space=pl.ANY)],
        out_specs=pl.BlockSpec(memory_space=pl.ANY),
        scratch_shapes=[sem_shape],
        cost_estimate=cost,
    )(x)


if __name__ == "__main__":
    key = jax.random.PRNGKey(0)
    # batch=2, features=input_node=2723 (the only shape hinted by __init__).
    x = jax.random.normal(key, (2, 2723), dtype=jnp.float32)

    # Primary path: what IPS.forward actually computes (no kernel launch).
    y = ips_forward(x)

    # Preferred materialized path: XLA-native copy.
    y_copy = jax.block_until_ready(ips_forward_materialized(x))

    # Opt-in Pallas DMA path (exercised once for validation).
    y_pallas = jax.block_until_ready(ips_forward_materialized_pallas(x))

    assert y.shape == x.shape and y.dtype == x.dtype
    assert y_copy.shape == x.shape and y_copy.dtype == x.dtype
    assert y_pallas.shape == x.shape and y_pallas.dtype == x.dtype
    assert bool(jnp.all(y == x))
    assert bool(jnp.all(y_copy == x))
    assert bool(jnp.all(y_pallas == x))

    print("KERNEL_OK")
</pallas_src>

<mosaic_0001>
module attributes {stable_mosaic.version = 11 : i64} {
  func.func @_whole_array_copy_kernel(%arg0: memref<2x2723xf32, #tpu.memory_space<any>>, %arg1: memref<2x2723xf32, #tpu.memory_space<any>>, %arg2: memref<!tpu.dma_semaphore, #tpu.memory_space<semaphore_mem>>) attributes {dimension_semantics = [], scalar_prefetch = 0 : i64, scratch_operands = 1 : i64, tpu.core_type = #tpu.core_type<tc>} {
    tpu.enqueue_dma source(%arg0 : memref<2x2723xf32, #tpu.memory_space<any>>) target(%arg1 : memref<2x2723xf32, #tpu.memory_space<any>>) target_semaphore(%arg2 : memref<!tpu.dma_semaphore, #tpu.memory_space<semaphore_mem>>)
    tpu.wait_dma2 semaphore(%arg2 : memref<!tpu.dma_semaphore, #tpu.memory_space<semaphore_mem>>) src(%arg0 : memref<2x2723xf32, #tpu.memory_space<any>>) dst(%arg1 : memref<2x2723xf32, #tpu.memory_space<any>>)
    return
  }
}

</mosaic_0001>

<bundles_post_ra>
// kernel: tpu_custom_call.1
= control target key start
LH: loop header
LB: loop body
LE: loop exit
PB: predicated region body
PF: predicated region fallthrough
CT: control target
= control target key end

     0   :  { %s29_s6 = smov [#allocation2]   ;;  %s30_s7 = smov 131072   ;;  %s48_s0 = inlined_call_operand.hbm [shape: f32[2,2723], index: 0, kind: input, shape index: {}]   ;;  %s49_s1 = inlined_call_operand.hbm [shape: f32[2,2723], index: 1, kind: output, shape index: {}]  }
   0x1   :  { %s31_s8 = smov 0  }
   0x2   :  { %12 = dma.general %s48_s0, 704, %s49_s1, %s29_s6, %s30_s7, [#allocation4], %s31_s8, 0  }
   0x3   :  { %27 = dma.done.wait [#allocation2], 704 }
   0x4   :  { %28 = vsyncadd [#allocation2], 4294966592 }
   0x5   :  { %17 = vsyncmov [#allocation2] }
   0x8   :  { %s18_s13 = vpop.sfrf %17 }
   0x9   :  { %p23_p0 = scmp.ne.s32.totalorder %s18_s13, 0 }
   0xb   :  { %22 = shalt.err (%p23_p0)  }

</bundles_post_ra>
